<compile_context>
chip_gen: v7x
topology: tpu7x:2x2x1
jax: 0.10.0
libtpu: 0.0.40
codegen_flags: <defaults>
</compile_context>

<pallas_src>
import functools

import jax
import jax.numpy as jnp
from jax.experimental import pallas as pl
from jax.experimental.pallas import tpu as pltpu


def _round_up(x, m):
    return ((x + m - 1) // m) * m


# ----------------------------------------------------------------------------
# Fused Pallas kernel: entire GraphConv stack in one call.
#   a_ref : (Np, Np)  bf16   normalized adjacency (zero-padded)
#   h_ref : (Np, Fp)  bf16   input node features  (zero-padded)
#   w*_ref: bf16 weights (zero-padded), b*_ref: (1, .) f32 biases
#   o_ref : (Np, Cp)  f32    lane-dense output block
#   h_scr : (Np, Hp)  f32    VMEM-resident activation between layers
# ----------------------------------------------------------------------------
def fused_gcn_kernel(a_ref, h_ref, w0_ref, b0_ref, w1_ref, b1_ref,
                     w2_ref, b2_ref, o_ref, h_scr, *, n_mid):
    a = a_ref[...]  # read once, reused by every layer (stays in vregs/VMEM)

    # ---- layer 0: in_feats -> n_hidden (expanding) => (A @ H) @ W0 ---------
    ah = jnp.dot(a, h_ref[...], preferred_element_type=jnp.float32)
    h_scr[...] = jnp.dot(ah.astype(jnp.bfloat16), w0_ref[...],
                         preferred_element_type=jnp.float32) + b0_ref[...]

    # ---- middle layers: SHARED weight W1, dropout = identity (eval mode) ---
    # TODO(synk): training-mode dropout (pltpu.prng_seed/prng_random_bits) omitted.
    for _ in range(n_mid):  # static unroll: n_mid is a trace-time Python int
        hw = jnp.dot(h_scr[...].astype(jnp.bfloat16), w1_ref[...],
                     preferred_element_type=jnp.float32)
        h_scr[...] = jnp.dot(a, hw.astype(jnp.bfloat16),
                             preferred_element_type=jnp.float32) + b1_ref[...]

    # ---- final layer: n_hidden -> n_classes (contracting) => A @ (H @ W2) --
    hw2 = jnp.dot(h_scr[...].astype(jnp.bfloat16), w2_ref[...],
                  preferred_element_type=jnp.float32)
    o_ref[...] = (jnp.dot(a, hw2.astype(jnp.bfloat16),
                          preferred_element_type=jnp.float32)
                  + b2_ref[...]).astype(o_ref.dtype)


# ----------------------------------------------------------------------------
# Wrapper: pad to lane-dense shapes, run the fused kernel, slice real result.
# ----------------------------------------------------------------------------
def net_forward_fused(a_hat, features, p0, p1, p2, n_layers):
    w0, b0 = p0
    w1, b1 = p1
    w2, b2 = p2
    n = a_hat.shape[0]
    f_in, hid = w0.shape
    cls = w2.shape[1]

    npad = _round_up(n, 128)      # lane-dense adjacency / activations
    fpad = _round_up(f_in, 128)
    hpad = _round_up(hid, 128)
    cpad = _round_up(cls, 128)    # lane-dense HBM output store

    # Zero-padding is exact: padded rows/cols of A_hat are zero, padded rows
    # of each W are zero, so real output rows/cols are unchanged.
    a_p = jnp.zeros((npad, npad), jnp.float32).at[:n, :n].set(a_hat).astype(jnp.bfloat16)
    h_p = jnp.zeros((npad, fpad), jnp.float32).at[:n, :f_in].set(features).astype(jnp.bfloat16)
    w0_p = jnp.zeros((fpad, hpad), jnp.float32).at[:f_in, :hid].set(w0).astype(jnp.bfloat16)
    b0_p = jnp.zeros((1, hpad), jnp.float32).at[0, :hid].set(b0)
    w1_p = jnp.zeros((hpad, hpad), jnp.float32).at[:hid, :hid].set(w1).astype(jnp.bfloat16)
    b1_p = jnp.zeros((1, hpad), jnp.float32).at[0, :hid].set(b1)
    w2_p = jnp.zeros((hpad, cpad), jnp.float32).at[:hid, :cls].set(w2).astype(jnp.bfloat16)
    b2_p = jnp.zeros((1, cpad), jnp.float32).at[0, :cls].set(b2)

    out_p = pl.pallas_call(
        functools.partial(fused_gcn_kernel, n_mid=n_layers - 1),
        out_shape=jax.ShapeDtypeStruct((npad, cpad), jnp.float32),
        in_specs=[
            pl.BlockSpec((npad, npad), lambda: (0, 0)),
            pl.BlockSpec((npad, fpad), lambda: (0, 0)),
            pl.BlockSpec((fpad, hpad), lambda: (0, 0)),
            pl.BlockSpec((1, hpad), lambda: (0, 0)),
            pl.BlockSpec((hpad, hpad), lambda: (0, 0)),
            pl.BlockSpec((1, hpad), lambda: (0, 0)),
            pl.BlockSpec((hpad, cpad), lambda: (0, 0)),
            pl.BlockSpec((1, cpad), lambda: (0, 0)),
        ],
        out_specs=pl.BlockSpec((npad, cpad), lambda: (0, 0)),
        scratch_shapes=[pltpu.VMEM((npad, hpad), jnp.float32)],
    )(a_p, h_p, w0_p, b0_p, w1_p, b1_p, w2_p, b2_p)

    return out_p[:n, :cls]


# ----------------------------------------------------------------------------
# Model glue (plain JAX): parameter setup and graph normalization.
# ----------------------------------------------------------------------------
def glorot(key, shape):
    fan_in, fan_out = shape
    limit = jnp.sqrt(6.0 / (fan_in + fan_out))
    return jax.random.uniform(key, shape, jnp.float32, -limit, limit)


def init_net_params(key, in_feats, n_hidden, n_classes):
    k0, k1, k2 = jax.random.split(key, 3)
    p_gnn = (glorot(k0, (in_feats, n_hidden)), jnp.zeros((n_hidden,), jnp.float32))
    p_gnn1 = (glorot(k1, (n_hidden, n_hidden)), jnp.zeros((n_hidden,), jnp.float32))
    p_gnn2 = (glorot(k2, (n_hidden, n_classes)), jnp.zeros((n_classes,), jnp.float32))
    return p_gnn, p_gnn1, p_gnn2


def normalize_adjacency(adj):
    """Â = D^{-1/2} A D^{-1/2} (DGL GraphConv norm='both')."""
    deg = jnp.sum(adj, axis=1)
    inv_sqrt = jnp.where(deg > 0, 1.0 / jnp.sqrt(deg), 0.0)
    return inv_sqrt[:, None] * adj * inv_sqrt[None, :]


# Pure-JAX reference mirroring the kernel's bf16-input / f32-accum numerics.
def _bf16_mm(x, y):
    return jnp.dot(x.astype(jnp.bfloat16), y.astype(jnp.bfloat16),
                   preferred_element_type=jnp.float32)


def net_forward_ref(a_hat, features, p0, p1, p2, n_layers):
    w0, b0 = p0
    w1, b1 = p1
    w2, b2 = p2
    h = _bf16_mm(_bf16_mm(a_hat, features), w0) + b0          # expanding
    for _ in range(n_layers - 1):                              # dropout = id (eval)
        h = _bf16_mm(a_hat, _bf16_mm(h, w1)) + b1
    h = _bf16_mm(a_hat, _bf16_mm(h, w2)) + b2                  # contracting
    return h


# ----------------------------------------------------------------------------
if __name__ == "__main__":
    N_NODES = 16
    IN_FEATS = 8
    N_LAYERS = 2       # -> total GraphConv layers = N_LAYERS + 1 = 3
    N_HIDDEN = 32
    N_CLASSES = 4
    DROPOUT = 0.5      # identity in eval mode

    key = jax.random.PRNGKey(0)
    k_feat, k_adj, k_params = jax.random.split(key, 3)

    # Deterministic random graph (symmetric, with self-loops) as dense adjacency.
    rand = jax.random.uniform(k_adj, (N_NODES, N_NODES))
    adj = (rand + rand.T > 1.3).astype(jnp.float32)
    adj = adj + jnp.eye(N_NODES, dtype=jnp.float32)  # self-loops
    adj = jnp.clip(adj, 0.0, 1.0)
    a_hat = normalize_adjacency(adj)

    features = jax.random.normal(k_feat, (N_NODES, IN_FEATS), jnp.float32)
    p0, p1, p2 = init_net_params(k_params, IN_FEATS, N_HIDDEN, N_CLASSES)

    out = net_forward_fused(a_hat, features, p0, p1, p2, N_LAYERS)
    out = jax.block_until_ready(out)

    assert out.shape == (N_NODES, N_CLASSES), out.shape
    assert jnp.all(jnp.isfinite(out))

    ref = net_forward_ref(a_hat, features, p0, p1, p2, N_LAYERS)
    assert jnp.allclose(out, ref, rtol=1e-2, atol=1e-2), (
        float(jnp.max(jnp.abs(out - ref))))

    print("KERNEL_OK")
</pallas_src>

<mosaic_0001>
module attributes {stable_mosaic.version = 11 : i64} {
  func.func @fused_gcn_kernel(%arg0: memref<128x128xbf16, #tpu.memory_space<vmem>>, %arg1: memref<128x128xbf16, #tpu.memory_space<vmem>>, %arg2: memref<128x128xbf16, #tpu.memory_space<vmem>>, %arg3: memref<1x128xf32, #tpu.memory_space<vmem>>, %arg4: memref<128x128xbf16, #tpu.memory_space<vmem>>, %arg5: memref<1x128xf32, #tpu.memory_space<vmem>>, %arg6: memref<128x128xbf16, #tpu.memory_space<vmem>>, %arg7: memref<1x128xf32, #tpu.memory_space<vmem>>, %arg8: memref<128x128xf32, #tpu.memory_space<vmem>>, %arg9: memref<128x128xf32, #tpu.memory_space<vmem>>) attributes {dimension_semantics = [], scalar_prefetch = 0 : i64, scratch_operands = 1 : i64, tpu.core_type = #tpu.core_type<tc>} {
    %c0 = arith.constant 0 : index
    %c0_0 = arith.constant 0 : index
    %0 = vector.load %arg0[%c0, %c0_0] : memref<128x128xbf16, #tpu.memory_space<vmem>>, vector<128x128xbf16>
    %c0_1 = arith.constant 0 : index
    %c0_2 = arith.constant 0 : index
    %1 = vector.load %arg1[%c0_1, %c0_2] : memref<128x128xbf16, #tpu.memory_space<vmem>>, vector<128x128xbf16>
    %cst = arith.constant dense<0.000000e+00> : vector<128x128xf32>
    %2 = tpu.matmul %0, %1, %cst {dimension_numbers = #tpu.dot_dimension_numbers<[1], [0], [0], [1], [0, 0, 1, 1], [], []>} : vector<128x128xbf16>, vector<128x128xbf16>, vector<128x128xf32> -> vector<128x128xf32>
    %3 = arith.truncf %2 : vector<128x128xf32> to vector<128x128xbf16>
    %c0_3 = arith.constant 0 : index
    %c0_4 = arith.constant 0 : index
    %4 = vector.load %arg2[%c0_3, %c0_4] : memref<128x128xbf16, #tpu.memory_space<vmem>>, vector<128x128xbf16>
    %cst_5 = arith.constant dense<0.000000e+00> : vector<128x128xf32>
    %5 = tpu.matmul %3, %4, %cst_5 {dimension_numbers = #tpu.dot_dimension_numbers<[1], [0], [0], [1], [0, 0, 1, 1], [], []>} : vector<128x128xbf16>, vector<128x128xbf16>, vector<128x128xf32> -> vector<128x128xf32>
    %c0_6 = arith.constant 0 : index
    %c0_7 = arith.constant 0 : index
    %6 = vector.load %arg3[%c0_6, %c0_7] : memref<1x128xf32, #tpu.memory_space<vmem>>, vector<1x128xf32>
    %7 = vector.broadcast %6 : vector<1x128xf32> to vector<128x128xf32>
    %8 = arith.addf %5, %7 : vector<128x128xf32>
    %c0_8 = arith.constant 0 : index
    %c0_9 = arith.constant 0 : index
    %9 = vector.load %arg9[%c0_8, %c0_9] : memref<128x128xf32, #tpu.memory_space<vmem>>, vector<128x128xf32>
    tpu.vector_store %arg9[%c0_8, %c0_9], %8 {strides = array<i32>} : memref<128x128xf32, #tpu.memory_space<vmem>>, vector<128x128xf32>,
    %c0_10 = arith.constant 0 : index
    %c0_11 = arith.constant 0 : index
    %10 = vector.load %arg9[%c0_10, %c0_11] : memref<128x128xf32, #tpu.memory_space<vmem>>, vector<128x128xf32>
    %11 = arith.truncf %10 : vector<128x128xf32> to vector<128x128xbf16>
    %c0_12 = arith.constant 0 : index
    %c0_13 = arith.constant 0 : index
    %12 = vector.load %arg4[%c0_12, %c0_13] : memref<128x128xbf16, #tpu.memory_space<vmem>>, vector<128x128xbf16>
    %cst_14 = arith.constant dense<0.000000e+00> : vector<128x128xf32>
    %13 = tpu.matmul %11, %12, %cst_14 {dimension_numbers = #tpu.dot_dimension_numbers<[1], [0], [0], [1], [0, 0, 1, 1], [], []>} : vector<128x128xbf16>, vector<128x128xbf16>, vector<128x128xf32> -> vector<128x128xf32>
    %14 = arith.truncf %13 : vector<128x128xf32> to vector<128x128xbf16>
    %cst_15 = arith.constant dense<0.000000e+00> : vector<128x128xf32>
    %15 = tpu.matmul %0, %14, %cst_15 {dimension_numbers = #tpu.dot_dimension_numbers<[1], [0], [0], [1], [0, 0, 1, 1], [], []>} : vector<128x128xbf16>, vector<128x128xbf16>, vector<128x128xf32> -> vector<128x128xf32>
    %c0_16 = arith.constant 0 : index
    %c0_17 = arith.constant 0 : index
    %16 = vector.load %arg5[%c0_16, %c0_17] : memref<1x128xf32, #tpu.memory_space<vmem>>, vector<1x128xf32>
    %17 = vector.broadcast %16 : vector<1x128xf32> to vector<128x128xf32>
    %18 = arith.addf %15, %17 : vector<128x128xf32>
    %c0_18 = arith.constant 0 : index
    %c0_19 = arith.constant 0 : index
    %19 = vector.load %arg9[%c0_18, %c0_19] : memref<128x128xf32, #tpu.memory_space<vmem>>, vector<128x128xf32>
    tpu.vector_store %arg9[%c0_18, %c0_19], %18 {strides = array<i32>} : memref<128x128xf32, #tpu.memory_space<vmem>>, vector<128x128xf32>,
    %c0_20 = arith.constant 0 : index
    %c0_21 = arith.constant 0 : index
    %20 = vector.load %arg9[%c0_20, %c0_21] : memref<128x128xf32, #tpu.memory_space<vmem>>, vector<128x128xf32>
    %21 = arith.truncf %20 : vector<128x128xf32> to vector<128x128xbf16>
    %c0_22 = arith.constant 0 : index
    %c0_23 = arith.constant 0 : index
    %22 = vector.load %arg6[%c0_22, %c0_23] : memref<128x128xbf16, #tpu.memory_space<vmem>>, vector<128x128xbf16>
    %cst_24 = arith.constant dense<0.000000e+00> : vector<128x128xf32>
    %23 = tpu.matmul %21, %22, %cst_24 {dimension_numbers = #tpu.dot_dimension_numbers<[1], [0], [0], [1], [0, 0, 1, 1], [], []>} : vector<128x128xbf16>, vector<128x128xbf16>, vector<128x128xf32> -> vector<128x128xf32>
    %24 = arith.truncf %23 : vector<128x128xf32> to vector<128x128xbf16>
    %cst_25 = arith.constant dense<0.000000e+00> : vector<128x128xf32>
    %25 = tpu.matmul %0, %24, %cst_25 {dimension_numbers = #tpu.dot_dimension_numbers<[1], [0], [0], [1], [0, 0, 1, 1], [], []>} : vector<128x128xbf16>, vector<128x128xbf16>, vector<128x128xf32> -> vector<128x128xf32>
    %c0_26 = arith.constant 0 : index
    %c0_27 = arith.constant 0 : index
    %26 = vector.load %arg7[%c0_26, %c0_27] : memref<1x128xf32, #tpu.memory_space<vmem>>, vector<1x128xf32>
    %27 = vector.broadcast %26 : vector<1x128xf32> to vector<128x128xf32>
    %28 = arith.addf %25, %27 : vector<128x128xf32>
    %c0_28 = arith.constant 0 : index
    %c0_29 = arith.constant 0 : index
    %29 = vector.load %arg8[%c0_28, %c0_29] : memref<128x128xf32, #tpu.memory_space<vmem>>, vector<128x128xf32>
    tpu.vector_store %arg8[%c0_28, %c0_29], %28 {strides = array<i32>} : memref<128x128xf32, #tpu.memory_space<vmem>>, vector<128x128xf32>,
    return
  }
}

</mosaic_0001>

<bundles_post_ra>
// kernel: tpu_custom_call.1
= control target key start
LH: loop header
LB: loop body
LE: loop exit
PB: predicated region body
PF: predicated region fallthrough
CT: control target
= control target key end

     0   :  { %13 = vsyncpa [#allocation4], 0  ;;  %s1887_s0 = inlined_call_operand.hbm [shape: bf16[128,128], index: 0, kind: input, shape index: {}]   ;;  %s1888_s1 = inlined_call_operand.hbm [shape: bf16[128,128], index: 1, kind: input, shape index: {}]   ;;  %s1889_s2 = inlined_call_operand.hbm [shape: bf16[128,128], index: 2, kind: input, shape index: {}]   ;;  %s1890_s3 = inlined_call_operand.vmem [shape: f32[1,128], index: 3, kind: input, shape index: {}]   ;;  %s1891_s4 = inlined_call_operand.hbm [shape: bf16[128,128], index: 4, kind: input, shape index: {}]   ;;  %s1892_s5 = inlined_call_operand.vmem [shape: f32[1,128], index: 5, kind: input, shape index: {}]   ;;  %s1893_s6 = inlined_call_operand.hbm [shape: bf16[128,128], index: 6, kind: input, shape index: {}]   ;;  %s1894_s7 = inlined_call_operand.vmem [shape: f32[1,128], index: 7, kind: input, shape index: {}]   ;;  %s1895_s8 = inlined_call_operand.hbm [shape: f32[128,128], index: 8, kind: output, shape index: {}]  }
   0x1   :  { %14 = vsyncpa [#allocation7], 0 }
   0x2   :  { %15 = vsyncpa [#allocation10], 0 }
   0x3   :  { %16 = vsyncpa [#allocation5], 0  ;;  %s1682_s27 = smov [#allocation6]   ;;  %s1683_s29 = smov [#allocation9]  }
   0x4   :  { %s34_s28 = sshll.u32 %s1682_s27, 4  ;;  %s60_s30 = sshll.u32 %s1683_s29, 4  ;;  %s35_s28 = int_to_ptr.vmem [resolvable:$true] %s34_s28  ;;  %s1737_s30 = int_to_ptr.vmem [resolvable:$true] %s60_s30 }
   0x5   :  { %s1542_s11 = scalar_lea.hbm %s1888_s1, 1024 }
   0x6   :  { %p1543_p0 = scmp.ne.s32.totalorder %s1888_s1, %s1542_s11  ;;  %p1546_p1 = scmp.lt.u32.totalorder %s1542_s11, %s1888_s1 }
   0x8   :  { %p1548_p2 = pnand %p1546_p1, %p1543_p0 }
   0xa   :  { %1551 = shalt.err (!%p1548_p2)
}
   0xb   :  { %s1552_s16 = scalar_lea.vmem %s35_s28, 1024  ;;  %p1557_p4 = scmp.lt.s32.totalorder %s35_s28, %s35_s28 }
   0xc   :  { %p1553_p3 = scmp.ne.s32.totalorder %s35_s28, %s1552_s16  ;;  %p1558_p5 = scmp.lt.s32.totalorder %s1552_s16, %s1552_s16 }
   0xe   :  { %p1559_p6 = por %p1558_p5, %p1557_p4 }
  0x10   :  { %p1560_p7 = pnand %p1559_p6, %p1553_p3 }
  0x12   :  { %1563 = shalt.err (!%p1560_p7)
}
  0x13   :  { %s1684_s17 = smov 64   ;;  %s1685_s18 = smov 4  }
  0x14   :  { %40 = dma.hbm_to_vmem [thread:$0]  %s1888_s1, 1024, %s35_s28, [#allocation7], %s1684_s17, %s1684_s17, %s1685_s18  }
  0x15   :  { %s1564_s23 = scalar_lea.hbm %s1891_s4, 1024 }
  0x16   :  { %p1565_p8 = scmp.ne.s32.totalorder %s1891_s4, %s1564_s23  ;;  %p1568_p9 = scmp.lt.u32.totalorder %s1564_s23, %s1891_s4 }
  0x18   :  { %p1570_p10 = pnand %p1568_p9, %p1565_p8 }
  0x1a   :  { %1573 = shalt.err (!%p1570_p10)
}
  0x1b   :  { %s1574_s29 = scalar_lea.vmem %s1737_s30, 1024  ;;  %p1579_p12 = scmp.lt.s32.totalorder %s1737_s30, %s1737_s30 }
  0x1c   :  { %p1575_p11 = scmp.ne.s32.totalorder %s1737_s30, %s1574_s29  ;;  %p1580_p13 = scmp.lt.s32.totalorder %s1574_s29, %s1574_s29 }
  0x1e   :  { %p1581_p0 = por %p1580_p13, %p1579_p12 }
  0x20   :  { %p1582_p1 = pnand %p1581_p0, %p1575_p11 }
  0x22   :  { %1585 = shalt.err (!%p1582_p1)
}
  0x23   :  { %66 = dma.hbm_to_vmem [thread:$0]  %s1891_s4, 1024, %s1737_s30, [#allocation10], %s1684_s17, %s1684_s17, %s1685_s18  }
  0x24   :  { %s1686_s9 = smov [#allocation3]   ;;  %s1687_s11 = smov [#allocation8]  }
  0x25   :  { %s22_s10 = sshll.u32 %s1686_s9, 4  ;;  %s46_s12 = sshll.u32 %s1687_s11, 4  ;;  %s23_s10 = int_to_ptr.vmem [resolvable:$true] %s22_s10  ;;  %s1774_s12 = int_to_ptr.vmem [resolvable:$true] %s46_s12 }
  0x26   :  { %s1586_s15 = scalar_lea.hbm %s1887_s0, 1024 }
  0x27   :  { %p1587_p2 = scmp.ne.s32.totalorder %s1887_s0, %s1586_s15  ;;  %p1590_p3 = scmp.lt.u32.totalorder %s1586_s15, %s1887_s0 }
  0x29   :  { %p1592_p4 = pnand %p1590_p3, %p1587_p2 }
  0x2b   :  { %1595 = shalt.err (!%p1592_p4)
}
  0x2c   :  { %s1596_s4 = scalar_lea.vmem %s23_s10, 1024  ;;  %p1601_p6 = scmp.lt.s32.totalorder %s23_s10, %s23_s10 }
  0x2d   :  { %p1597_p5 = scmp.ne.s32.totalorder %s23_s10, %s1596_s4  ;;  %p1602_p7 = scmp.lt.s32.totalorder %s1596_s4, %s1596_s4 }
  0x2f   :  { %p1603_p8 = por %p1602_p7, %p1601_p6 }
  0x31   :  { %p1604_p9 = pnand %p1603_p8, %p1597_p5 }
  0x33   :  { %1607 = shalt.err (!%p1604_p9)
}
  0x34   :  { %28 = dma.hbm_to_vmem [thread:$0]  %s1887_s0, 1024, %s23_s10, [#allocation4], %s1684_s17, %s1684_s17, %s1685_s18  }
  0x35   :  { %s1608_s25 = scalar_lea.hbm %s1889_s2, 1024 }
  0x36   :  { %p1609_p10 = scmp.ne.s32.totalorder %s1889_s2, %s1608_s25  ;;  %p1612_p11 = scmp.lt.u32.totalorder %s1608_s25, %s1889_s2 }
  0x38   :  { %p1614_p12 = pnand %p1612_p11, %p1609_p10 }
  0x3a   :  { %1617 = shalt.err (!%p1614_p12)
}
  0x3b   :  { %s1618_s28 = scalar_lea.vmem %s1774_s12, 1024  ;;  %p1623_p0 = scmp.lt.s32.totalorder %s1774_s12, %s1774_s12 }
  0x3c   :  { %p1619_p13 = scmp.ne.s32.totalorder %s1774_s12, %s1618_s28  ;;  %p1624_p1 = scmp.lt.s32.totalorder %s1618_s28, %s1618_s28 }
  0x3e   :  { %p1625_p2 = por %p1624_p1, %p1623_p0 }
  0x40   :  { %p1626_p3 = pnand %p1625_p2, %p1619_p13 }
  0x42   :  { %1629 = shalt.err (!%p1626_p3)
}
  0x43   :  { %52 = dma.hbm_to_vmem [thread:$0]  %s1889_s2, 1024, %s1774_s12, [#allocation7], %s1684_s17, %s1684_s17, %s1685_s18  }
  0x44   :  { %s1688_s10 = smov [#allocation11]   ;;  %s1630_s15 = scalar_lea.hbm %s1893_s6, 1024 }
  0x45   :  { %s74_s11 = sshll.u32 %s1688_s10, 4  ;;  %p1631_p4 = scmp.ne.s32.totalorder %s1893_s6, %s1630_s15  ;;  %s75_s11 = int_to_ptr.vmem [resolvable:$true] %s74_s11 }
  0x46   :  { %p1634_p5 = scmp.lt.u32.totalorder %s1630_s15, %s1893_s6 }
  0x48   :  { %p1636_p6 = pnand %p1634_p5, %p1631_p4 }
  0x4a   :  { %1639 = shalt.err (!%p1636_p6)
}
  0x4b   :  { %s1640_s4 = scalar_lea.vmem %s75_s11, 1024  ;;  %p1645_p8 = scmp.lt.s32.totalorder %s75_s11, %s75_s11 }
  0x4c   :  { %p1641_p7 = scmp.ne.s32.totalorder %s75_s11, %s1640_s4  ;;  %p1646_p9 = scmp.lt.s32.totalorder %s1640_s4, %s1640_s4 }
  0x4e   :  { %p1647_p10 = por %p1646_p9, %p1645_p8 }
  0x50   :  { %p1648_p11 = pnand %p1647_p10, %p1641_p7 }
  0x52   :  { %1651 = shalt.err (!%p1648_p11)
}
  0x53   :  { %80 = dma.hbm_to_vmem [thread:$0]  %s1893_s6, 1024, %s75_s11, [#allocation10], %s1684_s17, %s1684_s17, %s1685_s18  }
  0x54   :  { %1674 = dma.done.wait [#allocation4], 1024  }
  0x55   :  { %1675 = vsyncadd [#allocation4], 4294966272 }
  0x56   :  { %1676 = dma.done.wait [#allocation7], 2048  }
  0x57   :  { %1677 = vsyncadd [#allocation7], 4294965248 }
  0x58   :  { %1678 = dma.done.wait [#allocation10], 2048  }
  0x59   :  { %1679 = vsyncadd [#allocation10], 4294965248  ;;  %v1502_v0 = vld [vmem:[#allocation6] sm:$0xff]   ;;  %v1503_v1 = vld [vmem:[#allocation6 + $0x8] sm:$0xff]  }
  0x5a   :  { %1300 = vmatprep.subr.bf16.mxu0 %v1502_v0  ;;  %v1504_v2 = vld [vmem:[#allocation6 + $0x10] sm:$0xff]   ;;  %v1505_v3 = vld [vmem:[#allocation6 + $0x18] sm:$0xff]   ;;  %v1826_v4 = vld [vmem:[#allocation3] sm:$0xff]  }
  0x5b   :  { %1301 = vmatpush3.bf16.msra.mxu0 %v1502_v0  ;;  %1316 = vmatprep.mubr.bf16.mxu0 %v1826_v4  ;;  %v1506_v5 = vld [vmem:[#allocation6 + $0x20] sm:$0xff]   ;;  %v1507_v6 = vld [vmem:[#allocation6 + $0x28] sm:$0xff]   ;;  %v1508_v9 = vld [vmem:[#allocation6 + $0x30] sm:$0xff]  }
  0x5c   :  { %1302 = vmatprep.subr.bf16.mxu0 %v1503_v1  ;;  %v1518_v7 = vld [vmem:[#allocation8] sm:$0xff]   ;;  %v1519_v8 = vld [vmem:[#allocation8 + $0x8] sm:$0xff]   ;;  %v1520_v10 = vld [vmem:[#allocation8 + $0x10] sm:$0xff]  }
  0x5d   :  { %1332 = vmatprep.subr.bf16.mxu1 %v1518_v7  ;;  %v1509_v11 = vld [vmem:[#allocation6 + $0x38] sm:$0xff]   ;;  %v1522_v13 = vld [vmem:[#allocation8 + $0x20] sm:$0xff]   ;;  %v1829_v14 = vld [vmem:[#allocation3 + $0x8] sm:$0xff]  }
  0x5e   :  { %1333 = vmatpush3.bf16.msra.mxu1 %v1518_v7  ;;  %v1521_v12 = vld [vmem:[#allocation8 + $0x18] sm:$0xff]   ;;  %v1831_v15 = vld [vmem:[#allocation3 + $0x10] sm:$0xff]   ;;  %v1523_v16 = vld [vmem:[#allocation8 + $0x28] sm:$0xff]  }
  0x5f   :  { %1303 = vmatpush3.bf16.msra.mxu0 %v1503_v1  ;;  %1334 = vmatprep.subr.bf16.mxu1 %v1519_v8  ;;  %v1524_v17 = vld [vmem:[#allocation8 + $0x30] sm:$0xff]   ;;  %v1835_v18 = vld [vmem:[#allocation3 + $0x18] sm:$0xff]   ;;  %v1837_v19 = vld [vmem:[#allocation3 + $0x20] sm:$0xff]  }
  0x60   :  { %1304 = vmatprep.subr.bf16.mxu0 %v1504_v2  ;;  %v1841_v20 = vld [vmem:[#allocation3 + $0x28] sm:$0xff]   ;;  %v1843_v21 = vld [vmem:[#allocation3 + $0x30] sm:$0xff]   ;;  %v1847_v22 = vld [vmem:[#allocation3 + $0x38] sm:$0xff]  }
  0x61   :  { %v1525_v23 = vld [vmem:[#allocation8 + $0x38] sm:$0xff]   ;;  %v1526_v24 = vld [vmem:[#allocation9] sm:$0xff]   ;;  %v1527_v25 = vld [vmem:[#allocation9 + $0x8] sm:$0xff]  }
  0x62   :  { %1335 = vmatpush3.bf16.msra.mxu1 %v1519_v8  ;;  %v1528_v26 = vld [vmem:[#allocation9 + $0x10] sm:$0xff]   ;;  %v1529_v27 = vld [vmem:[#allocation9 + $0x18] sm:$0xff]   ;;  %v1530_v28 = vld [vmem:[#allocation9 + $0x20] sm:$0xff]  }
  0x63   :  { %1305 = vmatpush3.bf16.msra.mxu0 %v1504_v2  ;;  %1336 = vmatprep.subr.bf16.mxu1 %v1520_v10  ;;  %v1531_v29 = vld [vmem:[#allocation9 + $0x28] sm:$0xff]   ;;  %v1532_v54 = vld [vmem:[#allocation9 + $0x30] sm:$0xff]   ;;  %v1533_v55 = vld [vmem:[#allocation9 + $0x38] sm:$0xff]  }
  0x64   :  { %1306 = vmatprep.subr.bf16.mxu0 %v1505_v3  ;;  %v1177_v57 = vld [vmem:[%s1890_s3] ss:$0 sm:$0xff] }
  0x66   :  { %1337 = vmatpush3.bf16.msra.mxu1 %v1520_v10 }
  0x67   :  { %1307 = vmatpush3.bf16.msra.mxu0 %v1505_v3  ;;  %1338 = vmatprep.subr.bf16.mxu1 %v1521_v12 }
  0x68   :  { %1308 = vmatprep.subr.bf16.mxu0 %v1506_v5 }
  0x6a   :  { %1339 = vmatpush3.bf16.msra.mxu1 %v1521_v12 }
  0x6b   :  { %1309 = vmatpush3.bf16.msra.mxu0 %v1506_v5  ;;  %1340 = vmatprep.subr.bf16.mxu1 %v1522_v13 }
  0x6c   :  { %1310 = vmatprep.subr.bf16.mxu0 %v1507_v6 }
  0x6e   :  { %1341 = vmatpush3.bf16.msra.mxu1 %v1522_v13 }
  0x6f   :  { %1311 = vmatpush3.bf16.msra.mxu0 %v1507_v6  ;;  %1342 = vmatprep.subr.bf16.mxu1 %v1523_v16 }
  0x70   :  { %1312 = vmatprep.subr.bf16.mxu0 %v1508_v9 }
  0x72   :  { %1343 = vmatpush3.bf16.msra.mxu1 %v1523_v16 }
  0x73   :  { %1313 = vmatpush3.bf16.msra.mxu0 %v1508_v9  ;;  %1344 = vmatprep.subr.bf16.mxu1 %v1524_v17 }
  0x74   :  { %1314 = vmatprep.subr.bf16.mxu0 %v1509_v11 }
  0x76   :  { %1345 = vmatpush3.bf16.msra.mxu1 %v1524_v17 }
  0x77   :  { %1315 = vmatpush3.bf16.msra.mxu0 %v1509_v11  ;;  %1346 = vmatprep.subr.bf16.mxu1 %v1525_v23 }
  0x78   :  { %1364 = vmatprep.subr.bf16.mxu0 %v1526_v24 }
  0x7a   :  { %1317 = vmatmul.mubr.bf16.vlgmr.msra.gmra.mrb[0].mxu0 %v1829_v14  ;;  %1347 = vmatpush3.bf16.msra.mxu1 %v1525_v23 }
  0x7b   :  { %1320 = vmatprep.mubr.bf16.mxu0 %v1831_v15  ;;  %1365 = vmatpush3.bf16.msra.mxu0 %v1526_v24 }
  0x7c   :  { %1366 = vmatprep.subr.bf16.mxu0 %v1527_v25 }
  0x7f   :  { %1367 = vmatpush3.bf16.msra.mxu0 %v1527_v25 }
  0x80   :  { %1368 = vmatprep.subr.bf16.mxu0 %v1528_v26 }
  0x82   :  { %1321 = vmatmul.mubr.bf16.gmra.mrb[4].mxu0 %v1835_v18 }
  0x83   :  { %1324 = vmatprep.mubr.bf16.mxu0 %v1837_v19  ;;  %1369 = vmatpush3.bf16.msra.mxu0 %v1528_v26 }
  0x84   :  { %1370 = vmatprep.subr.bf16.mxu0 %v1529_v27 }
  0x87   :  { %1371 = vmatpush3.bf16.msra.mxu0 %v1529_v27 }
  0x88   :  { %1372 = vmatprep.subr.bf16.mxu0 %v1530_v28 }
  0x8a   :  { %1325 = vmatmul.mubr.bf16.gmra.mrb[8].mxu0 %v1841_v20 }
  0x8b   :  { %1328 = vmatprep.mubr.bf16.mxu0 %v1843_v21  ;;  %1373 = vmatpush3.bf16.msra.mxu0 %v1530_v28 }
  0x8c   :  { %1374 = vmatprep.subr.bf16.mxu0 %v1531_v29 }
  0x8f   :  { %1375 = vmatpush3.bf16.msra.mxu0 %v1531_v29 }
  0x90   :  { %1376 = vmatprep.subr.bf16.mxu0 %v1532_v54 }
  0x92   :  { %1329 = vmatmul.mubr.bf16.gmra.mrb[12].mxu0 %v1847_v22 }
  0x93   :  { %1377 = vmatpush3.bf16.msra.mxu0 %v1532_v54 }
  0x94   :  { %1378 = vmatprep.subr.bf16.mxu0 %v1533_v55 }
  0x97   :  { %1379 = vmatpush3.bf16.msra.mxu0 %v1533_v55 }
 0x14d   :  { %v1318_v30 = vpop.f32.mrb[0].mxu0 }
 0x14e   :  { %v261_v31 = vpop.f32.mrb[1].mxu0 }
 0x14f   :  { %v1319_v32 = vpop.f32.mrb[2].mxu0 }
 0x150   :  { %v325_v33 = vpack.c.bf16 %v1319_v32, %v1318_v30  ;;  %v264_v34 = vpop.f32.mrb[3].mxu0 }
 0x151   :  { %v324_v35 = vpack.c.bf16 %v264_v34, %v261_v31 }
 0x153   :  { %1348 = vmatprep.mubr.bf16.mxu1 %v324_v35 }
 0x154   :  { %1349 = vmatmul.mubr.bf16.vlgmr.msra.gmra.mrb[0].mxu1 %v325_v33 }
 0x155   :  { %v1322_v36 = vpop.f32.mrb[4].mxu0 }
 0x156   :  { %v277_v37 = vpop.f32.mrb[5].mxu0 }
 0x157   :  { %v1323_v38 = vpop.f32.mrb[6].mxu0 }
 0x158   :  { %v327_v39 = vpack.c.bf16 %v1323_v38, %v1322_v36  ;;  %v280_v40 = vpop.f32.mrb[7].mxu0 }
 0x159   :  { %v326_v41 = vpack.c.bf16 %v280_v40, %v277_v37 }
 0x15b   :  { %1352 = vmatprep.mubr.bf16.mxu1 %v326_v41  ;;  %v1534_v41 = vld [vmem:[#allocation11] sm:$0xff]  }
 0x15c   :  { %1353 = vmatmul.mubr.bf16.gmra.mrb[4].mxu1 %v327_v39  ;;  %1428 = vmatprep.subr.bf16.mxu0 %v1534_v41 }
 0x15d   :  { %v1326_v42 = vpop.f32.mrb[8].mxu0 }
 0x15e   :  { %v293_v43 = vpop.f32.mrb[9].mxu0 }
 0x15f   :  { %v1327_v44 = vpop.f32.mrb[10].mxu0 }
 0x160   :  { %v329_v45 = vpack.c.bf16 %v1327_v44, %v1326_v42  ;;  %v296_v46 = vpop.f32.mrb[11].mxu0  ;;  %v1535_v42 = vld [vmem:[#allocation11 + $0x8] sm:$0xff]   ;;  %v1537_v44 = vld [vmem:[#allocation11 + $0x18] sm:$0xff]  }
 0x161   :  { %v328_v47 = vpack.c.bf16 %v296_v46, %v293_v43  ;;  %v1536_v43 = vld [vmem:[#allocation11 + $0x10] sm:$0xff]   ;;  %v1539_v46 = vld [vmem:[#allocation11 + $0x28] sm:$0xff]  }
 0x163   :  { %1356 = vmatprep.mubr.bf16.mxu1 %v328_v47 }
 0x164   :  { %1357 = vmatmul.mubr.bf16.gmra.mrb[8].mxu1 %v329_v45  ;;  %v1538_v45 = vld [vmem:[#allocation11 + $0x20] sm:$0xff]  }
 0x165   :  { %v1330_v48 = vpop.f32.mrb[12].mxu0 }
 0x166   :  { %v309_v49 = vpop.f32.mrb[13].mxu0 }
 0x167   :  { %v1331_v50 = vpop.f32.mrb[14].mxu0 }
 0x168   :  { %v331_v51 = vpack.c.bf16 %v1331_v50, %v1330_v48  ;;  %v312_v52 = vpop.f32.mrb[15].mxu0 }
 0x169   :  { %v330_v53 = vpack.c.bf16 %v312_v52, %v309_v49 }
 0x16b   :  { %1360 = vmatprep.mubr.bf16.mxu1 %v330_v53 }
 0x16c   :  { %1361 = vmatmul.mubr.bf16.gmra.mrb[12].mxu1 %v331_v51 }
 0x16d   :  { %1412 = vmatprep.mubr.bf16.mxu1 %v1826_v4 }
 0x227   :  { %v1350_v56 = vpop.f32.mrb[0].mxu1 }
 0x228   :  { %v437_v58 = vpop.f32.mrb[1].mxu1  ;;  %v446_v60 = vadd.f32 %v1350_v56, %v1177_v57 }
 0x229   :  { %v1351_v59 = vpop.f32.mrb[2].mxu1  ;;  %v438_v63 = vadd.f32 %v1177_v57, %v437_v58 }
 0x22a   :  { %v449_v61 = vadd.f32 %v1351_v59, %v1177_v57  ;;  %v440_v62 = vpop.f32.mrb[3].mxu1 }
 0x22b   :  { %v441_v0 = vadd.f32 %v1177_v57, %v440_v62 }
 0x22c   :  { %v533_v1 = vpack.c.bf16 %v449_v61, %v446_v60 }
 0x22d   :  { %v532_v2 = vpack.c.bf16 %v441_v0, %v438_v63 }
 0x22f   :  { %v1354_v3 = vpop.f32.mrb[4].mxu1  ;;  %1380 = vmatprep.mubr.bf16.mxu0 %v532_v2 }
 0x230   :  { %v453_v5 = vpop.f32.mrb[5].mxu1  ;;  %1381 = vmatmul.mubr.bf16.vlgmr.msra.gmra.mrb[16].mxu0 %v533_v1  ;;  %v462_v7 = vadd.f32 %v1354_v3, %v1177_v57 }
 0x231   :  { %v1355_v6 = vpop.f32.mrb[6].mxu1  ;;  %v454_v10 = vadd.f32 %v1177_v57, %v453_v5  ;;  %1429 = vmatpush3.bf16.msra.mxu0 %v1534_v41 }
 0x232   :  { %v465_v8 = vadd.f32 %v1355_v6, %v1177_v57  ;;  %v456_v9 = vpop.f32.mrb[7].mxu1  ;;  %1430 = vmatprep.subr.bf16.mxu0 %v1535_v42 }
 0x233   :  { %v457_v11 = vadd.f32 %v1177_v57, %v456_v9  ;;  %v1541_v9 = vld [vmem:[#allocation11 + $0x38] sm:$0xff]  }
 0x234   :  { %v535_v12 = vpack.c.bf16 %v465_v8, %v462_v7  ;;  %v1540_v8 = vld [vmem:[#allocation11 + $0x30] sm:$0xff]  }
 0x235   :  { %v534_v13 = vpack.c.bf16 %v457_v11, %v454_v10  ;;  %1431 = vmatpush3.bf16.msra.mxu0 %v1535_v42  ;;  %v1194_v11 = vld [vmem:[%s1892_s5] ss:$0 sm:$0xff] }
 0x236   :  { %1432 = vmatprep.subr.bf16.mxu0 %v1536_v43 }
 0x237   :  { %v1358_v16 = vpop.f32.mrb[8].mxu1  ;;  %1384 = vmatprep.mubr.bf16.mxu0 %v534_v13 }
 0x238   :  { %v469_v17 = vpop.f32.mrb[9].mxu1  ;;  %1385 = vmatmul.mubr.bf16.gmra.mrb[20].mxu0 %v535_v12  ;;  %v478_v24 = vadd.f32 %v1358_v16, %v1177_v57 }
 0x239   :  { %v1359_v23 = vpop.f32.mrb[10].mxu1  ;;  %v470_v27 = vadd.f32 %v1177_v57, %v469_v17  ;;  %1433 = vmatpush3.bf16.msra.mxu0 %v1536_v43 }
 0x23a   :  { %v481_v25 = vadd.f32 %v1359_v23, %v1177_v57  ;;  %v472_v26 = vpop.f32.mrb[11].mxu1  ;;  %1434 = vmatprep.subr.bf16.mxu0 %v1537_v44 }
 0x23b   :  { %v473_v28 = vadd.f32 %v1177_v57, %v472_v26 }
 0x23c   :  { %v537_v29 = vpack.c.bf16 %v481_v25, %v478_v24 }
 0x23d   :  { %v536_v30 = vpack.c.bf16 %v473_v28, %v470_v27  ;;  %1435 = vmatpush3.bf16.msra.mxu0 %v1537_v44 }
 0x23e   :  { %1436 = vmatprep.subr.bf16.mxu0 %v1538_v45 }
 0x23f   :  { %v1362_v31 = vpop.f32.mrb[12].mxu1  ;;  %1388 = vmatprep.mubr.bf16.mxu0 %v536_v30 }
 0x240   :  { %v485_v32 = vpop.f32.mrb[13].mxu1  ;;  %1389 = vmatmul.mubr.bf16.gmra.mrb[24].mxu0 %v537_v29  ;;  %v494_v34 = vadd.f32 %v1362_v31, %v1177_v57 }
 0x241   :  { %v1363_v33 = vpop.f32.mrb[14].mxu1  ;;  %v486_v37 = vadd.f32 %v1177_v57, %v485_v32  ;;  %1437 = vmatpush3.bf16.msra.mxu0 %v1538_v45 }
 0x242   :  { %v497_v35 = vadd.f32 %v1363_v33, %v1177_v57  ;;  %v488_v36 = vpop.f32.mrb[15].mxu1  ;;  %1438 = vmatprep.subr.bf16.mxu0 %v1539_v46 }
 0x243   :  { %v489_v38 = vadd.f32 %v1177_v57, %v488_v36 }
 0x244   :  { %v539_v39 = vpack.c.bf16 %v497_v35, %v494_v34 }
 0x245   :  { %v538_v40 = vpack.c.bf16 %v489_v38, %v486_v37  ;;  %1439 = vmatpush3.bf16.msra.mxu0 %v1539_v46 }
 0x246   :  { %1440 = vmatprep.subr.bf16.mxu0 %v1540_v8 }
 0x247   :  { %1392 = vmatprep.mubr.bf16.mxu0 %v538_v40 }
 0x248   :  { %1393 = vmatmul.mubr.bf16.gmra.mrb[28].mxu0 %v539_v39 }
 0x249   :  { %1441 = vmatpush3.bf16.msra.mxu0 %v1540_v8 }
 0x24a   :  { %1442 = vmatprep.subr.bf16.mxu0 %v1541_v9 }
 0x24d   :  { %1443 = vmatpush3.bf16.msra.mxu0 %v1541_v9 }
 0x303   :  { %v1382_v47 = vpop.f32.mrb[16].mxu0 }
 0x304   :  { %v638_v48 = vpop.f32.mrb[17].mxu0 }
 0x305   :  { %v1383_v49 = vpop.f32.mrb[18].mxu0 }
 0x306   :  { %v702_v50 = vpack.c.bf16 %v1383_v49, %v1382_v47  ;;  %v641_v51 = vpop.f32.mrb[19].mxu0 }
 0x307   :  { %v701_v52 = vpack.c.bf16 %v641_v51, %v638_v48 }
 0x309   :  { %1396 = vmatprep.subr.bf16.mxu1 %v701_v52 }
 0x30a   :  { %1397 = vmatpush3.bf16.msra.mxu1 %v701_v52 }
 0x30b   :  { %v1386_v53 = vpop.f32.mrb[20].mxu0  ;;  %1398 = vmatprep.subr.bf16.mxu1 %v702_v50 }
 0x30c   :  { %v654_v54 = vpop.f32.mrb[21].mxu0 }
 0x30d   :  { %v1387_v55 = vpop.f32.mrb[22].mxu0 }
 0x30e   :  { %v704_v56 = vpack.c.bf16 %v1387_v55, %v1386_v53  ;;  %v657_v57 = vpop.f32.mrb[23].mxu0  ;;  %1399 = vmatpush3.bf16.msra.mxu1 %v702_v50 }
 0x30f   :  { %v703_v58 = vpack.c.bf16 %v657_v57, %v654_v54 }
 0x311   :  { %1400 = vmatprep.subr.bf16.mxu1 %v703_v58 }
 0x312   :  { %1401 = vmatpush3.bf16.msra.mxu1 %v703_v58 }
 0x313   :  { %v1390_v59 = vpop.f32.mrb[24].mxu0  ;;  %1402 = vmatprep.subr.bf16.mxu1 %v704_v56 }
 0x314   :  { %v670_v60 = vpop.f32.mrb[25].mxu0 }
 0x315   :  { %v1391_v61 = vpop.f32.mrb[26].mxu0 }
 0x316   :  { %v706_v62 = vpack.c.bf16 %v1391_v61, %v1390_v59  ;;  %v673_v63 = vpop.f32.mrb[27].mxu0  ;;  %1403 = vmatpush3.bf16.msra.mxu1 %v704_v56 }
 0x317   :  { %v705_v0 = vpack.c.bf16 %v673_v63, %v670_v60 }
 0x319   :  { %1404 = vmatprep.subr.bf16.mxu1 %v705_v0 }
 0x31a   :  { %1405 = vmatpush3.bf16.msra.mxu1 %v705_v0 }
 0x31b   :  { %v1394_v1 = vpop.f32.mrb[28].mxu0  ;;  %1406 = vmatprep.subr.bf16.mxu1 %v706_v62 }
 0x31c   :  { %v686_v2 = vpop.f32.mrb[29].mxu0 }
 0x31d   :  { %v1395_v3 = vpop.f32.mrb[30].mxu0 }
 0x31e   :  { %v708_v5 = vpack.c.bf16 %v1395_v3, %v1394_v1  ;;  %v689_v6 = vpop.f32.mrb[31].mxu0  ;;  %1407 = vmatpush3.bf16.msra.mxu1 %v706_v62 }
 0x31f   :  { %v707_v7 = vpack.c.bf16 %v689_v6, %v686_v2 }
 0x321   :  { %1408 = vmatprep.subr.bf16.mxu1 %v707_v7 }
 0x322   :  { %1409 = vmatpush3.bf16.msra.mxu1 %v707_v7 }
 0x323   :  { %1410 = vmatprep.subr.bf16.mxu1 %v708_v5 }
 0x326   :  { %1411 = vmatpush3.bf16.msra.mxu1 %v708_v5 }
 0x329   :  { %1413 = vmatmul.mubr.bf16.vlgmr.msra.gmra.mrb[16].mxu1 %v1829_v14 }
 0x32a   :  { %1416 = vmatprep.mubr.bf16.mxu1 %v1831_v15 }
 0x331   :  { %1417 = vmatmul.mubr.bf16.gmra.mrb[20].mxu1 %v1835_v18 }
 0x332   :  { %1420 = vmatprep.mubr.bf16.mxu1 %v1837_v19 }
 0x339   :  { %1421 = vmatmul.mubr.bf16.gmra.mrb[24].mxu1 %v1841_v20 }
 0x33a   :  { %1424 = vmatprep.mubr.bf16.mxu1 %v1843_v21 }
 0x341   :  { %1425 = vmatmul.mubr.bf16.gmra.mrb[28].mxu1 %v1847_v22 }
 0x342   :  { %1476 = vmatprep.mubr.bf16.mxu1 %v1826_v4 }
 0x3fc   :  { %v1414_v10 = vpop.f32.mrb[16].mxu1 }
 0x3fd   :  { %v750_v12 = vpop.f32.mrb[17].mxu1  ;;  %v759_v16 = vadd.f32 %v1414_v10, %v1194_v11 }
 0x3fe   :  { %v1415_v13 = vpop.f32.mrb[18].mxu1  ;;  %v751_v24 = vadd.f32 %v1194_v11, %v750_v12 }
 0x3ff   :  { %v762_v17 = vadd.f32 %v1415_v13, %v1194_v11  ;;  %v753_v23 = vpop.f32.mrb[19].mxu1 }
 0x400   :  { %v754_v25 = vadd.f32 %v1194_v11, %v753_v23 }
 0x401   :  { %v846_v26 = vpack.c.bf16 %v762_v17, %v759_v16 }
 0x402   :  { %v845_v4 = vpack.c.bf16 %v754_v25, %v751_v24  ;;  %v1203_v25 = vld [vmem:[%s1894_s7] ss:$0 sm:$0xff]  ;;  %s1689_s7 = smov [#allocation12]  }
 0x403   :  { %s1147_s22 = sshll.u32 %s1689_s7, 4  ;;  %s1148_s22 = int_to_ptr.vmem [resolvable:$true] %s1147_s22 }
 0x404   :  { %v1418_v27 = vpop.f32.mrb[20].mxu1  ;;  %1444 = vmatprep.mubr.bf16.mxu0 %v845_v4  ;;  %s1652_s23 = scalar_lea.vmem %s1148_s22, 2048  ;;  %p1657_p13 = scmp.lt.s32.totalorder %s1148_s22, %s1148_s22 }
 0x405   :  { %v766_v28 = vpop.f32.mrb[21].mxu1  ;;  %1445 = vmatmul.mubr.bf16.vlgmr.msra.gmra.mrb[32].mxu0 %v846_v26  ;;  %v775_v30 = vadd.f32 %v1418_v27, %v1194_v11  ;;  %p1653_p12 = scmp.ne.s32.totalorder %s1148_s22, %s1652_s23  ;;  %p1658_p0 = scmp.lt.s32.totalorder %s1652_s23, %s1652_s23 }
 0x406   :  { %v1419_v29 = vpop.f32.mrb[22].mxu1  ;;  %v767_v33 = vadd.f32 %v1194_v11, %v766_v28 }
 0x407   :  { %v778_v31 = vadd.f32 %v1419_v29, %v1194_v11  ;;  %v769_v32 = vpop.f32.mrb[23].mxu1  ;;  %p1659_p1 = por %p1658_p0, %p1657_p13 }
 0x408   :  { %v770_v34 = vadd.f32 %v1194_v11, %v769_v32 }
 0x409   :  { %v848_v35 = vpack.c.bf16 %v778_v31, %v775_v30  ;;  %p1660_p2 = pnand %p1659_p1, %p1653_p12 }
 0x40a   :  { %v847_v36 = vpack.c.bf16 %v770_v34, %v767_v33 }
 0x40c   :  { %v1422_v37 = vpop.f32.mrb[24].mxu1  ;;  %1448 = vmatprep.mubr.bf16.mxu0 %v847_v36 }
 0x40d   :  { %v782_v38 = vpop.f32.mrb[25].mxu1  ;;  %1449 = vmatmul.mubr.bf16.gmra.mrb[36].mxu0 %v848_v35  ;;  %v791_v40 = vadd.f32 %v1422_v37, %v1194_v11 }
 0x40e   :  { %v1423_v39 = vpop.f32.mrb[26].mxu1  ;;  %v783_v43 = vadd.f32 %v1194_v11, %v782_v38 }
 0x40f   :  { %v794_v41 = vadd.f32 %v1423_v39, %v1194_v11  ;;  %v785_v42 = vpop.f32.mrb[27].mxu1 }
 0x410   :  { %v786_v44 = vadd.f32 %v1194_v11, %v785_v42 }
 0x411   :  { %v850_v45 = vpack.c.bf16 %v794_v41, %v791_v40 }
 0x412   :  { %v849_v46 = vpack.c.bf16 %v786_v44, %v783_v43 }
 0x414   :  { %v1426_v47 = vpop.f32.mrb[28].mxu1  ;;  %1452 = vmatprep.mubr.bf16.mxu0 %v849_v46 }
 0x415   :  { %v798_v48 = vpop.f32.mrb[29].mxu1  ;;  %1453 = vmatmul.mubr.bf16.gmra.mrb[40].mxu0 %v850_v45  ;;  %v807_v50 = vadd.f32 %v1426_v47, %v1194_v11 }
 0x416   :  { %v1427_v49 = vpop.f32.mrb[30].mxu1  ;;  %v799_v53 = vadd.f32 %v1194_v11, %v798_v48 }
 0x417   :  { %v810_v51 = vadd.f32 %v1427_v49, %v1194_v11  ;;  %v801_v52 = vpop.f32.mrb[31].mxu1 }
 0x418   :  { %v802_v54 = vadd.f32 %v1194_v11, %v801_v52 }
 0x419   :  { %v852_v55 = vpack.c.bf16 %v810_v51, %v807_v50 }
 0x41a   :  { %v851_v56 = vpack.c.bf16 %v802_v54, %v799_v53 }
 0x41c   :  { %1456 = vmatprep.mubr.bf16.mxu0 %v851_v56 }
 0x41d   :  { %1457 = vmatmul.mubr.bf16.gmra.mrb[44].mxu0 %v852_v55 }
 0x4d8   :  { %v1446_v57 = vpop.f32.mrb[32].mxu0 }
 0x4d9   :  { %v951_v58 = vpop.f32.mrb[33].mxu0 }
 0x4da   :  { %v1447_v59 = vpop.f32.mrb[34].mxu0 }
 0x4db   :  { %v1015_v60 = vpack.c.bf16 %v1447_v59, %v1446_v57  ;;  %v954_v61 = vpop.f32.mrb[35].mxu0 }
 0x4dc   :  { %v1014_v62 = vpack.c.bf16 %v954_v61, %v951_v58 }
 0x4de   :  { %1460 = vmatprep.subr.bf16.mxu1 %v1014_v62 }
 0x4df   :  { %1461 = vmatpush3.bf16.msra.mxu1 %v1014_v62 }
 0x4e0   :  { %v1450_v63 = vpop.f32.mrb[36].mxu0  ;;  %1462 = vmatprep.subr.bf16.mxu1 %v1015_v60 }
 0x4e1   :  { %v967_v0 = vpop.f32.mrb[37].mxu0 }
 0x4e2   :  { %v1451_v1 = vpop.f32.mrb[38].mxu0 }
 0x4e3   :  { %v1017_v2 = vpack.c.bf16 %v1451_v1, %v1450_v63  ;;  %v970_v3 = vpop.f32.mrb[39].mxu0  ;;  %1463 = vmatpush3.bf16.msra.mxu1 %v1015_v60 }
 0x4e4   :  { %v1016_v5 = vpack.c.bf16 %v970_v3, %v967_v0 }
 0x4e6   :  { %1464 = vmatprep.subr.bf16.mxu1 %v1016_v5 }
 0x4e7   :  { %1465 = vmatpush3.bf16.msra.mxu1 %v1016_v5 }
 0x4e8   :  { %v1454_v6 = vpop.f32.mrb[40].mxu0  ;;  %1466 = vmatprep.subr.bf16.mxu1 %v1017_v2 }
 0x4e9   :  { %v983_v7 = vpop.f32.mrb[41].mxu0 }
 0x4ea   :  { %v1455_v8 = vpop.f32.mrb[42].mxu0 }
 0x4eb   :  { %v1019_v9 = vpack.c.bf16 %v1455_v8, %v1454_v6  ;;  %v986_v10 = vpop.f32.mrb[43].mxu0  ;;  %1467 = vmatpush3.bf16.msra.mxu1 %v1017_v2 }
 0x4ec   :  { %v1018_v11 = vpack.c.bf16 %v986_v10, %v983_v7 }
 0x4ee   :  { %1468 = vmatprep.subr.bf16.mxu1 %v1018_v11 }
 0x4ef   :  { %1469 = vmatpush3.bf16.msra.mxu1 %v1018_v11 }
 0x4f0   :  { %v1458_v12 = vpop.f32.mrb[44].mxu0  ;;  %1470 = vmatprep.subr.bf16.mxu1 %v1019_v9 }
 0x4f1   :  { %v999_v13 = vpop.f32.mrb[45].mxu0 }
 0x4f2   :  { %v1459_v16 = vpop.f32.mrb[46].mxu0 }
 0x4f3   :  { %v1021_v17 = vpack.c.bf16 %v1459_v16, %v1458_v12  ;;  %v1002_v23 = vpop.f32.mrb[47].mxu0  ;;  %1471 = vmatpush3.bf16.msra.mxu1 %v1019_v9 }
 0x4f4   :  { %v1020_v24 = vpack.c.bf16 %v1002_v23, %v999_v13 }
 0x4f6   :  { %1472 = vmatprep.subr.bf16.mxu1 %v1020_v24 }
 0x4f7   :  { %1473 = vmatpush3.bf16.msra.mxu1 %v1020_v24 }
 0x4f8   :  { %1474 = vmatprep.subr.bf16.mxu1 %v1021_v17 }
 0x4fb   :  { %1475 = vmatpush3.bf16.msra.mxu1 %v1021_v17 }
 0x4fe   :  { %1477 = vmatmul.mubr.bf16.vlgmr.msra.gmra.mrb[32].mxu1 %v1829_v14 }
 0x4ff   :  { %1480 = vmatprep.mubr.bf16.mxu1 %v1831_v15 }
 0x506   :  { %1481 = vmatmul.mubr.bf16.gmra.mrb[36].mxu1 %v1835_v18 }
 0x507   :  { %1484 = vmatprep.mubr.bf16.mxu1 %v1837_v19 }
 0x50e   :  { %1485 = vmatmul.mubr.bf16.gmra.mrb[40].mxu1 %v1841_v20 }
 0x50f   :  { %1488 = vmatprep.mubr.bf16.mxu1 %v1843_v21 }
 0x516   :  { %1489 = vmatmul.mubr.bf16.gmra.mrb[44].mxu1 %v1847_v22 }
 0x5d1   :  { %v1478_v26 = vpop.f32.mrb[32].mxu1 }
 0x5d2   :  { %v1072_v4 = vadd.f32 %v1478_v26, %v1203_v25  ;;  %v1063_v27 = vpop.f32.mrb[33].mxu1 }
 0x5d3   :  { %v1064_v14 = vadd.f32 %v1203_v25, %v1063_v27  ;;  %v1479_v28 = vpop.f32.mrb[34].mxu1 }
 0x5d4   :  { %1128 = vst [vmem:[#allocation12 + $0x10] sm:$0xff] %v1072_v4  ;;  %v1075_v15 = vadd.f32 %v1479_v28, %v1203_v25  ;;  %v1066_v18 = vpop.f32.mrb[35].mxu1 }
 0x5d5   :  { %1126 = vst [vmem:[#allocation12] sm:$0xff] %v1064_v14  ;;  %v1067_v19 = vadd.f32 %v1203_v25, %v1066_v18 }
 0x5d6   :  { %1129 = vst [vmem:[#allocation12 + $0x18] sm:$0xff] %v1075_v15 }
 0x5d7   :  { %1127 = vst [vmem:[#allocation12 + $0x8] sm:$0xff] %v1067_v19 }
 0x5d9   :  { %v1482_v20 = vpop.f32.mrb[36].mxu1 }
 0x5da   :  { %v1088_v21 = vadd.f32 %v1482_v20, %v1203_v25  ;;  %v1079_v29 = vpop.f32.mrb[37].mxu1 }
 0x5db   :  { %v1080_v22 = vadd.f32 %v1203_v25, %v1079_v29  ;;  %v1483_v30 = vpop.f32.mrb[38].mxu1 }
 0x5dc   :  { %1132 = vst [vmem:[#allocation12 + $0x30] sm:$0xff] %v1088_v21  ;;  %v1091_v31 = vadd.f32 %v1483_v30, %v1203_v25  ;;  %v1082_v32 = vpop.f32.mrb[39].mxu1 }
 0x5dd   :  { %1130 = vst [vmem:[#allocation12 + $0x20] sm:$0xff] %v1080_v22  ;;  %v1083_v33 = vadd.f32 %v1203_v25, %v1082_v32 }
 0x5de   :  { %1133 = vst [vmem:[#allocation12 + $0x38] sm:$0xff] %v1091_v31 }
 0x5df   :  { %1131 = vst [vmem:[#allocation12 + $0x28] sm:$0xff] %v1083_v33 }
 0x5e1   :  { %v1486_v34 = vpop.f32.mrb[40].mxu1 }
 0x5e2   :  { %v1104_v35 = vadd.f32 %v1486_v34, %v1203_v25  ;;  %v1095_v36 = vpop.f32.mrb[41].mxu1 }
 0x5e3   :  { %v1096_v37 = vadd.f32 %v1203_v25, %v1095_v36  ;;  %v1487_v38 = vpop.f32.mrb[42].mxu1 }
 0x5e4   :  { %1136 = vst [vmem:[#allocation12 + $0x50] sm:$0xff] %v1104_v35  ;;  %v1107_v39 = vadd.f32 %v1487_v38, %v1203_v25  ;;  %v1098_v40 = vpop.f32.mrb[43].mxu1 }
 0x5e5   :  { %1134 = vst [vmem:[#allocation12 + $0x40] sm:$0xff] %v1096_v37  ;;  %v1099_v41 = vadd.f32 %v1203_v25, %v1098_v40 }
 0x5e6   :  { %1137 = vst [vmem:[#allocation12 + $0x58] sm:$0xff] %v1107_v39 }
 0x5e7   :  { %1135 = vst [vmem:[#allocation12 + $0x48] sm:$0xff] %v1099_v41 }
 0x5e9   :  { %v1490_v42 = vpop.f32.mrb[44].mxu1 }
 0x5ea   :  { %v1120_v43 = vadd.f32 %v1490_v42, %v1203_v25  ;;  %v1111_v44 = vpop.f32.mrb[45].mxu1 }
 0x5eb   :  { %v1112_v45 = vadd.f32 %v1203_v25, %v1111_v44  ;;  %v1491_v46 = vpop.f32.mrb[46].mxu1 }
 0x5ec   :  { %1140 = vst [vmem:[#allocation12 + $0x70] sm:$0xff] %v1120_v43  ;;  %v1123_v47 = vadd.f32 %v1491_v46, %v1203_v25  ;;  %v1114_v48 = vpop.f32.mrb[47].mxu1 }
 0x5ed   :  { %1138 = vst [vmem:[#allocation12 + $0x60] sm:$0xff] %v1112_v45  ;;  %v1115_v49 = vadd.f32 %v1203_v25, %v1114_v48 }
 0x5ee   :  { %1141 = vst [vmem:[#allocation12 + $0x78] sm:$0xff] %v1123_v47 }
 0x5ef   :  { %1139 = vst [vmem:[#allocation12 + $0x68] sm:$0xff] %v1115_v49 }
 0x5f0   :  { %1663 = shalt.err (!%p1660_p2)
}
 0x5f1   :  { %s1664_s26 = scalar_lea.hbm %s1895_s8, 2048 }
 0x5f2   :  { %p1665_p3 = scmp.ne.s32.totalorder %s1895_s8, %s1664_s26  ;;  %p1668_p4 = scmp.lt.u32.totalorder %s1664_s26, %s1895_s8 }
 0x5f4   :  { %p1670_p5 = pnand %p1668_p4, %p1665_p3 }
 0x5f6   :  { %1673 = shalt.err (!%p1670_p5)
}
 0x5f7   :  { %s1690_s0 = smov 128   ;;  %s1691_s9 = smov 8  }
 0x5f8   :  { %1153 = dma.vmem_to_hbm [thread:$0]  %s1148_s22, 2048, %s1895_s8, [#allocation5], %s1690_s0, %s1690_s0, %s1691_s9  }
 0x5f9   :  { %1680 = dma.done.wait [#allocation5], 2048  }
 0x5fa   :  { %1681 = vsyncadd [#allocation5], 4294965248 }
 0x5fb   :  { %1157 = vsyncpa [#allocation4], 1 }
 0x5fc   :  { %1158 = vsyncpa [#allocation7], 1 }
 0x5fd   :  { %1159 = vsyncpa [#allocation10], 1 }
 0x5fe   :  { %1160 = vsyncpa [#allocation5], 1 }

</bundles_post_ra>
